<compile_context>
chip_gen: v6e
topology: v6e:2x2x1
jax: 0.10.0
libtpu: 0.0.40
codegen_flags: <defaults>
</compile_context>

<pallas_src>
import math

import jax
import jax.numpy as jnp
from jax.experimental import pallas as pl
from jax.experimental.pallas import tpu as pltpu


# ---------------------------------------------------------------------------
# Tiling / VMEM helpers
# ---------------------------------------------------------------------------
def _sublane_multiple(dtype):
    # Native sublane packing: f32 -> 8, bf16 -> 16, int8/fp8 -> 32.
    return max(8, 32 // jnp.dtype(dtype).itemsize)


def _pick_tile(dim, target, dtype):
    """Largest tile <= target that divides dim and keeps TPU tiling legal."""
    if dim <= target:
        return dim                      # full dim is always a legal block dim
    sub = _sublane_multiple(dtype)
    for t in range(target, sub - 1, -1):
        if dim % t == 0 and t % sub == 0:
            return t
    return dim


def _physical_vmem_bytes():
    try:
        return int(pltpu.get_tpu_info().vmem_capacity_bytes)
    except Exception:
        return 64 << 20                 # conservative default (v7x per-core)


def _vmem_limit_bytes(block_bytes, resident_bytes=0, scratch_bytes=0):
    # Pipelined blocks are double-buffered; resident weights / scratch are not.
    est = 2 * block_bytes + 2 * resident_bytes + scratch_bytes
    est = int(est * 1.3) + (2 << 20)
    # ~96 MiB ceiling on 128-MiB parts (v5e/v6e), ~48 MiB on 64-MiB v7x.
    cap = (_physical_vmem_bytes() * 3) // 4
    return max(8 << 20, min(est, cap))


# ---------------------------------------------------------------------------
# 1) Fused QKV projection, emitted directly in (B, h, S, dk) layout
# ---------------------------------------------------------------------------
def _qkv_proj_kernel(xq_ref, xk_ref, xv_ref, wq_ref, wk_ref, wv_ref,
                     q_ref, k_ref, v_ref):
    # Per-head [ts, D] @ [D, dk] MXU matmuls with f32 accumulation.  Writing
    # each head straight into the (1, h, ts, dk) output block produces the
    # attention layout here, so the wrapper never does an XLA head-split
    # transpose (an extra HBM read+write pass per tensor).
    h = wq_ref.shape[0]
    xq = xq_ref[0]                      # [ts, D]
    xk = xk_ref[0]
    xv = xv_ref[0]
    for head in range(h):               # static, unrolled
        q_ref[0, head] = jnp.dot(
            xq, wq_ref[head], preferred_element_type=jnp.float32
        ).astype(q_ref.dtype)
        k_ref[0, head] = jnp.dot(
            xk, wk_ref[head], preferred_element_type=jnp.float32
        ).astype(k_ref.dtype)
        v_ref[0, head] = jnp.dot(
            xv, wv_ref[head], preferred_element_type=jnp.float32
        ).astype(v_ref.dtype)


def _qkv_projection(xq, xk, xv, wq_h, wk_h, wv_h, *, ts):
    B, S, D = xq.shape
    h, _, dk = wq_h.shape
    grid = (B, S // ts)

    x_spec = pl.BlockSpec((1, ts, D), lambda b, s: (b, s, 0))
    # Constant index_map => weight slabs are fetched once and stay resident.
    w_spec = pl.BlockSpec((h, D, dk), lambda b, s: (0, 0, 0))
    out_spec = pl.BlockSpec((1, h, ts, dk), lambda b, s: (b, 0, s, 0))

    itemsize = xq.dtype.itemsize
    block_bytes = (3 * ts * D + 3 * h * ts * dk) * itemsize
    resident_bytes = 3 * h * D * dk * itemsize
    cost = pl.CostEstimate(
        flops=2 * 3 * B * S * D * D,
        transcendentals=0,
        bytes_accessed=(6 * B * S * D + 3 * D * D) * itemsize,
    )
    out_sds = jax.ShapeDtypeStruct((B, h, S, dk), xq.dtype)
    return pl.pallas_call(
        _qkv_proj_kernel,
        out_shape=(out_sds, out_sds, out_sds),
        grid_spec=pltpu.PrefetchScalarGridSpec(
            num_scalar_prefetch=0,
            grid=grid,
            in_specs=[x_spec, x_spec, x_spec, w_spec, w_spec, w_spec],
            out_specs=[out_spec, out_spec, out_spec],
        ),
        compiler_params=pltpu.CompilerParams(
            # Both axes parallel: B * (S/ts) >= 2 keeps both v7x TensorCores fed.
            dimension_semantics=("parallel", "parallel"),
            vmem_limit_bytes=_vmem_limit_bytes(block_bytes, resident_bytes),
        ),
        cost_estimate=cost,
    )(xq, xk, xv, wq_h, wk_h, wv_h)


# ---------------------------------------------------------------------------
# 2) Flash attention (online softmax) + fused output projection
# ---------------------------------------------------------------------------
def _flash_out_kernel(q_ref, k_ref, v_ref, wo_ref, o_ref, m_sc, l_sc, acc_sc):
    ki = pl.program_id(2)

    @pl.when(ki == 0)
    def _():
        m_sc[...] = jnp.full_like(m_sc, -jnp.inf)
        l_sc[...] = jnp.zeros_like(l_sc)
        acc_sc[...] = jnp.zeros_like(acc_sc)

    q = q_ref[0]            # [h, tq, dk]   (1/sqrt(d_k) already folded into Wq)
    k = k_ref[0]            # [h, tk, dk]
    v = v_ref[0]            # [h, tk, dk]

    # bf16 MXU matmuls (default path) with f32 softmax statistics/accumulator.
    s = jnp.einsum('hqe,hke->hqk', q, k, preferred_element_type=jnp.float32)
    m_prev = m_sc[...]
    m_new = jnp.maximum(m_prev, s.max(axis=-1, keepdims=True))
    alpha = jnp.exp(m_prev - m_new)
    p = jnp.exp(s - m_new)
    l_sc[...] = alpha * l_sc[...] + p.sum(axis=-1, keepdims=True)
    # p is cast to the (bf16) compute dtype so the PV matmul also runs bf16.
    acc_sc[...] = alpha * acc_sc[...] + jnp.einsum(
        'hqk,hke->hqe', p.astype(v.dtype), v,
        preferred_element_type=jnp.float32)
    m_sc[...] = m_new
    # TODO(synk): optional attention-mask path (masked_fill) not implemented
    # (mask=None in this scope); nn.Dropout is identity in eval mode.

    @pl.when(ki == pl.num_programs(2) - 1)
    def _():
        h, tq, dk = acc_sc.shape
        D = o_ref.shape[-1]
        # EUP approximate reciprocal + one Newton step (~f32 accuracy).
        l = l_sc[...]
        inv = pl.reciprocal(l, approx=True)
        inv = inv * (2.0 - l * inv)
        ctx = (acc_sc[...] * inv).astype(wo_ref.dtype)        # [h, tq, dk]
        # Fused output projection: out = sum_head ctx[head] @ Wo.T[head*dk:(head+1)*dk, :]
        # The store is a lane-dense [tq, h*dk] block straight into (B, S, D),
        # so no ctx HBM round trip and no third pallas_call.
        out = jnp.zeros((tq, D), jnp.float32)
        for head in range(h):                                  # static, unrolled
            out = out + jnp.dot(ctx[head], wo_ref[head],
                                preferred_element_type=jnp.float32)
        o_ref[0] = out.astype(o_ref.dtype)


def _flash_attention_out(q, k, v, wo_h, *, tq, tk, out_dtype):
    B, h, S, dk = q.shape
    D = h * dk
    grid = (B, S // tq, S // tk)

    q_spec = pl.BlockSpec((1, h, tq, dk), lambda b, qi, ki: (b, 0, qi, 0))
    kv_spec = pl.BlockSpec((1, h, tk, dk), lambda b, qi, ki: (b, 0, ki, 0))
    wo_spec = pl.BlockSpec((h, dk, D), lambda b, qi, ki: (0, 0, 0))   # resident
    o_spec = pl.BlockSpec((1, tq, D), lambda b, qi, ki: (b, qi, 0))   # lane-dense

    itemsize = q.dtype.itemsize
    block_bytes = (h * tq * dk + 2 * h * tk * dk) * itemsize + tq * D * jnp.dtype(out_dtype).itemsize
    resident_bytes = h * dk * D * itemsize
    scratch_bytes = h * tq * (dk + 2 * 128) * 4          # lane-padded m/l + acc (f32)
    kv_restream = S // tq                                # K/V re-read once per q tile
    cost = pl.CostEstimate(
        flops=4 * B * h * S * S * dk + 2 * B * S * D * D,
        transcendentals=B * h * S * S,
        bytes_accessed=(B * S * D * (2 + 2 * kv_restream) + D * D) * itemsize,
    )
    return pl.pallas_call(
        _flash_out_kernel,
        out_shape=jax.ShapeDtypeStruct((B, S, D), out_dtype),
        grid_spec=pltpu.PrefetchScalarGridSpec(
            num_scalar_prefetch=0,
            grid=grid,
            in_specs=[q_spec, kv_spec, kv_spec, wo_spec],
            out_specs=o_spec,
            scratch_shapes=[
                pltpu.VMEM((h, tq, 1), jnp.float32),     # running max
                pltpu.VMEM((h, tq, 1), jnp.float32),     # running sum
                pltpu.VMEM((h, tq, dk), jnp.float32),    # context accumulator
            ],
        ),
        compiler_params=pltpu.CompilerParams(
            dimension_semantics=("parallel", "parallel", "arbitrary"),
            vmem_limit_bytes=_vmem_limit_bytes(block_bytes, resident_bytes,
                                               scratch_bytes),
        ),
        cost_estimate=cost,
    )(q, k, v, wo_h)


# ---------------------------------------------------------------------------
# Full module forward
# ---------------------------------------------------------------------------
def multi_headed_attention(xq, xk, xv, wq, wk, wv, wo, *, h,
                           seq_tile=256, q_tile=256, kv_tile=256,
                           compute_dtype=jnp.bfloat16):
    """Pallas version of MultiHeadedAttention.forward (mask=None, eval mode)."""
    B, S, D = xq.shape
    assert D % h == 0
    dk = D // h
    scale = 1.0 / math.sqrt(dk)
    out_dtype = xq.dtype

    # nn.Linear convention: y = x @ W.T (bias=False).  Reorganize the
    # transposed weights into per-head slabs so neither kernel ever needs a
    # lane-dim reshape/transpose of activations:
    #   wq_h[head] = Wq.T[:, head*dk:(head+1)*dk]   -> [h, D, dk]
    #   wo_h[head] = Wo.T[head*dk:(head+1)*dk, :]   -> [h, dk, D]
    # The 1/sqrt(d_k) score scale is folded into Wq once here.
    wq_h = (wq.T * scale).reshape(D, h, dk).transpose(1, 0, 2).astype(compute_dtype)
    wk_h = wk.T.reshape(D, h, dk).transpose(1, 0, 2).astype(compute_dtype)
    wv_h = wv.T.reshape(D, h, dk).transpose(1, 0, 2).astype(compute_dtype)
    wo_h = wo.T.reshape(h, dk, D).astype(compute_dtype)

    # bf16 MXU fast path by default; f32 accumulation is preserved in-kernel.
    xq = xq.astype(compute_dtype)
    xk = xk.astype(compute_dtype)
    xv = xv.astype(compute_dtype)

    ts = _pick_tile(S, seq_tile, compute_dtype)
    tq = _pick_tile(S, q_tile, compute_dtype)
    tk = _pick_tile(S, kv_tile, compute_dtype)

    # TODO(synk): when xq is xk is xv (self-attention) the three x streams and
    # weight slabs could be fused into a single [ts,D]@[D,3D]-style pass.

    # 1) QKV projection, emitted directly in the (B, h, S, dk) attention layout.
    q, k, v = _qkv_projection(xq, xk, xv, wq_h, wk_h, wv_h, ts=ts)

    # 2) Flash attention (online softmax over KV tiles) with the output
    #    projection fused into the finalize -> lane-dense (B, S, D) output.
    return _flash_attention_out(q, k, v, wo_h, tq=tq, tk=tk, out_dtype=out_dtype)


def reference(xq, xk, xv, wq, wk, wv, wo, h):
    """Pure-JAX reference reproducing the PyTorch forward (mask=None, eval)."""
    B, S, D = xq.shape
    dk = D // h
    q = (xq @ wq.T).reshape(B, S, h, dk).transpose(0, 2, 1, 3)
    k = (xk @ wk.T).reshape(B, S, h, dk).transpose(0, 2, 1, 3)
    v = (xv @ wv.T).reshape(B, S, h, dk).transpose(0, 2, 1, 3)
    scores = (q @ jnp.swapaxes(k, -2, -1)) / math.sqrt(dk)
    p = jax.nn.softmax(scores, axis=-1)
    ctx = (p @ v).transpose(0, 2, 1, 3).reshape(B, S, D)
    return ctx @ wo.T


if __name__ == "__main__":
    B, S, d_model, n_heads = 2, 8, 32, 4

    key = jax.random.PRNGKey(0)
    k_q, k_k, k_v, k_wq, k_wk, k_wv, k_wo = jax.random.split(key, 7)

    xq = jax.random.normal(k_q, (B, S, d_model), dtype=jnp.float32)
    xk = jax.random.normal(k_k, (B, S, d_model), dtype=jnp.float32)
    xv = jax.random.normal(k_v, (B, S, d_model), dtype=jnp.float32)

    # deterministic "Linear" weights, shape [out_features, in_features]
    bound = 1.0 / math.sqrt(d_model)
    wq = jax.random.uniform(k_wq, (d_model, d_model), jnp.float32, -bound, bound)
    wk = jax.random.uniform(k_wk, (d_model, d_model), jnp.float32, -bound, bound)
    wv = jax.random.uniform(k_wv, (d_model, d_model), jnp.float32, -bound, bound)
    wo = jax.random.uniform(k_wo, (d_model, d_model), jnp.float32, -bound, bound)

    ref = reference(xq, xk, xv, wq, wk, wv, wo, n_heads)

    # (a) f32 compute path: tight numerical check of the kernel math.
    out_f32 = multi_headed_attention(xq, xk, xv, wq, wk, wv, wo, h=n_heads,
                                     compute_dtype=jnp.float32)
    out_f32 = jax.block_until_ready(out_f32)
    assert out_f32.shape == (B, S, d_model)
    err32 = float(jnp.max(jnp.abs(out_f32 - ref)))
    assert jnp.allclose(out_f32, ref, atol=5e-4, rtol=5e-4), f"f32 max abs err {err32}"

    # (b) bf16 MXU fast path (default): looser tolerance vs the f32 reference.
    out_bf = multi_headed_attention(xq, xk, xv, wq, wk, wv, wo, h=n_heads)
    out_bf = jax.block_until_ready(out_bf)
    assert out_bf.shape == (B, S, d_model)
    out_bf32 = out_bf.astype(jnp.float32)
    errbf = float(jnp.max(jnp.abs(out_bf32 - ref)))
    assert jnp.allclose(out_bf32, ref, atol=3e-2, rtol=3e-2), f"bf16 max abs err {errbf}"

    print("KERNEL_OK")
</pallas_src>

<mosaic_0001>
module attributes {stable_mosaic.version = 11 : i64} {
  func.func @_qkv_proj_kernel(%arg0: i32, %arg1: i32, %arg2: memref<1x8x32xf32, #tpu.memory_space<vmem>>, %arg3: memref<1x8x32xf32, #tpu.memory_space<vmem>>, %arg4: memref<1x8x32xf32, #tpu.memory_space<vmem>>, %arg5: memref<4x32x8xf32, #tpu.memory_space<vmem>>, %arg6: memref<4x32x8xf32, #tpu.memory_space<vmem>>, %arg7: memref<4x32x8xf32, #tpu.memory_space<vmem>>, %arg8: memref<1x4x8x8xf32, #tpu.memory_space<vmem>>, %arg9: memref<1x4x8x8xf32, #tpu.memory_space<vmem>>, %arg10: memref<1x4x8x8xf32, #tpu.memory_space<vmem>>) attributes {dimension_semantics = [#tpu.dimension_semantics<parallel>, #tpu.dimension_semantics<parallel>], iteration_bounds = array<i64: 2, 1>, scalar_prefetch = 0 : i64, scratch_operands = 0 : i64, tpu.core_type = #tpu.core_type<tc>, window_params = [{transform_indices = @transform_0, window_bounds = array<i64: 1, 8, 32>}, {transform_indices = @transform_1, window_bounds = array<i64: 1, 8, 32>}, {transform_indices = @transform_2, window_bounds = array<i64: 1, 8, 32>}, {pipeline_mode = #tpu.pipeline_mode<synchronous>, transform_indices = @transform_3, window_bounds = array<i64: 4, 32, 8>}, {pipeline_mode = #tpu.pipeline_mode<synchronous>, transform_indices = @transform_4, window_bounds = array<i64: 4, 32, 8>}, {pipeline_mode = #tpu.pipeline_mode<synchronous>, transform_indices = @transform_5, window_bounds = array<i64: 4, 32, 8>}, {transform_indices = @transform_6, window_bounds = array<i64: 1, 4, 8, 8>}, {transform_indices = @transform_7, window_bounds = array<i64: 1, 4, 8, 8>}, {transform_indices = @transform_8, window_bounds = array<i64: 1, 4, 8, 8>}]} {
    %c0 = arith.constant 0 : index
    %c0_0 = arith.constant 0 : index
    %c0_1 = arith.constant 0 : index
    %0 = vector.load %arg2[%c0, %c0_0, %c0_1] : memref<1x8x32xf32, #tpu.memory_space<vmem>>, vector<1x8x32xf32>
    %1 = vector.shape_cast %0 : vector<1x8x32xf32> to vector<8x32xf32>
    %c0_2 = arith.constant 0 : index
    %c0_3 = arith.constant 0 : index
    %c0_4 = arith.constant 0 : index
    %2 = vector.load %arg3[%c0_2, %c0_3, %c0_4] : memref<1x8x32xf32, #tpu.memory_space<vmem>>, vector<1x8x32xf32>
    %3 = vector.shape_cast %2 : vector<1x8x32xf32> to vector<8x32xf32>
    %c0_5 = arith.constant 0 : index
    %c0_6 = arith.constant 0 : index
    %c0_7 = arith.constant 0 : index
    %4 = vector.load %arg4[%c0_5, %c0_6, %c0_7] : memref<1x8x32xf32, #tpu.memory_space<vmem>>, vector<1x8x32xf32>
    %5 = vector.shape_cast %4 : vector<1x8x32xf32> to vector<8x32xf32>
    %c0_8 = arith.constant 0 : index
    %c0_9 = arith.constant 0 : index
    %c0_10 = arith.constant 0 : index
    %6 = vector.load %arg5[%c0_8, %c0_9, %c0_10] : memref<4x32x8xf32, #tpu.memory_space<vmem>>, vector<1x32x8xf32>
    %7 = vector.shape_cast %6 : vector<1x32x8xf32> to vector<32x8xf32>
    %cst = arith.constant dense<0.000000e+00> : vector<8x8xf32>
    %8 = tpu.matmul %1, %7, %cst {dimension_numbers = #tpu.dot_dimension_numbers<[1], [0], [0], [1], [0, 0, 1, 1], [], []>} : vector<8x32xf32>, vector<32x8xf32>, vector<8x8xf32> -> vector<8x8xf32>
    %c0_11 = arith.constant 0 : index
    %c0_12 = arith.constant 0 : index
    %c0_13 = arith.constant 0 : index
    %c0_14 = arith.constant 0 : index
    %9 = vector.load %arg8[%c0_11, %c0_12, %c0_13, %c0_14] : memref<1x4x8x8xf32, #tpu.memory_space<vmem>>, vector<1x1x8x8xf32>
    %10 = vector.shape_cast %9 : vector<1x1x8x8xf32> to vector<8x8xf32>
    %11 = vector.shape_cast %8 : vector<8x8xf32> to vector<1x1x8x8xf32>
    tpu.vector_store %arg8[%c0_11, %c0_12, %c0_13, %c0_14], %11 {strides = array<i32>} : memref<1x4x8x8xf32, #tpu.memory_space<vmem>>, vector<1x1x8x8xf32>,
    %c0_15 = arith.constant 0 : index
    %c0_16 = arith.constant 0 : index
    %c0_17 = arith.constant 0 : index
    %12 = vector.load %arg6[%c0_15, %c0_16, %c0_17] : memref<4x32x8xf32, #tpu.memory_space<vmem>>, vector<1x32x8xf32>
    %13 = vector.shape_cast %12 : vector<1x32x8xf32> to vector<32x8xf32>
    %cst_18 = arith.constant dense<0.000000e+00> : vector<8x8xf32>
    %14 = tpu.matmul %3, %13, %cst_18 {dimension_numbers = #tpu.dot_dimension_numbers<[1], [0], [0], [1], [0, 0, 1, 1], [], []>} : vector<8x32xf32>, vector<32x8xf32>, vector<8x8xf32> -> vector<8x8xf32>
    %c0_19 = arith.constant 0 : index
    %c0_20 = arith.constant 0 : index
    %c0_21 = arith.constant 0 : index
    %c0_22 = arith.constant 0 : index
    %15 = vector.load %arg9[%c0_19, %c0_20, %c0_21, %c0_22] : memref<1x4x8x8xf32, #tpu.memory_space<vmem>>, vector<1x1x8x8xf32>
    %16 = vector.shape_cast %15 : vector<1x1x8x8xf32> to vector<8x8xf32>
    %17 = vector.shape_cast %14 : vector<8x8xf32> to vector<1x1x8x8xf32>
    tpu.vector_store %arg9[%c0_19, %c0_20, %c0_21, %c0_22], %17 {strides = array<i32>} : memref<1x4x8x8xf32, #tpu.memory_space<vmem>>, vector<1x1x8x8xf32>,
    %c0_23 = arith.constant 0 : index
    %c0_24 = arith.constant 0 : index
    %c0_25 = arith.constant 0 : index
    %18 = vector.load %arg7[%c0_23, %c0_24, %c0_25] : memref<4x32x8xf32, #tpu.memory_space<vmem>>, vector<1x32x8xf32>
    %19 = vector.shape_cast %18 : vector<1x32x8xf32> to vector<32x8xf32>
    %cst_26 = arith.constant dense<0.000000e+00> : vector<8x8xf32>
    %20 = tpu.matmul %5, %19, %cst_26 {dimension_numbers = #tpu.dot_dimension_numbers<[1], [0], [0], [1], [0, 0, 1, 1], [], []>} : vector<8x32xf32>, vector<32x8xf32>, vector<8x8xf32> -> vector<8x8xf32>
    %c0_27 = arith.constant 0 : index
    %c0_28 = arith.constant 0 : index
    %c0_29 = arith.constant 0 : index
    %c0_30 = arith.constant 0 : index
    %21 = vector.load %arg10[%c0_27, %c0_28, %c0_29, %c0_30] : memref<1x4x8x8xf32, #tpu.memory_space<vmem>>, vector<1x1x8x8xf32>
    %22 = vector.shape_cast %21 : vector<1x1x8x8xf32> to vector<8x8xf32>
    %23 = vector.shape_cast %20 : vector<8x8xf32> to vector<1x1x8x8xf32>
    tpu.vector_store %arg10[%c0_27, %c0_28, %c0_29, %c0_30], %23 {strides = array<i32>} : memref<1x4x8x8xf32, #tpu.memory_space<vmem>>, vector<1x1x8x8xf32>,
    %c1 = arith.constant 1 : index
    %c0_31 = arith.constant 0 : index
    %c0_32 = arith.constant 0 : index
    %24 = vector.load %arg5[%c1, %c0_31, %c0_32] : memref<4x32x8xf32, #tpu.memory_space<vmem>>, vector<1x32x8xf32>
    %25 = vector.shape_cast %24 : vector<1x32x8xf32> to vector<32x8xf32>
    %cst_33 = arith.constant dense<0.000000e+00> : vector<8x8xf32>
    %26 = tpu.matmul %1, %25, %cst_33 {dimension_numbers = #tpu.dot_dimension_numbers<[1], [0], [0], [1], [0, 0, 1, 1], [], []>} : vector<8x32xf32>, vector<32x8xf32>, vector<8x8xf32> -> vector<8x8xf32>
    %c0_34 = arith.constant 0 : index
    %c1_35 = arith.constant 1 : index
    %c0_36 = arith.constant 0 : index
    %c0_37 = arith.constant 0 : index
    %27 = vector.load %arg8[%c0_34, %c1_35, %c0_36, %c0_37] : memref<1x4x8x8xf32, #tpu.memory_space<vmem>>, vector<1x1x8x8xf32>
    %28 = vector.shape_cast %27 : vector<1x1x8x8xf32> to vector<8x8xf32>
    %29 = vector.shape_cast %26 : vector<8x8xf32> to vector<1x1x8x8xf32>
    tpu.vector_store %arg8[%c0_34, %c1_35, %c0_36, %c0_37], %29 {strides = array<i32>} : memref<1x4x8x8xf32, #tpu.memory_space<vmem>>, vector<1x1x8x8xf32>,
    %c1_38 = arith.constant 1 : index
    %c0_39 = arith.constant 0 : index
    %c0_40 = arith.constant 0 : index
    %30 = vector.load %arg6[%c1_38, %c0_39, %c0_40] : memref<4x32x8xf32, #tpu.memory_space<vmem>>, vector<1x32x8xf32>
    %31 = vector.shape_cast %30 : vector<1x32x8xf32> to vector<32x8xf32>
    %cst_41 = arith.constant dense<0.000000e+00> : vector<8x8xf32>
    %32 = tpu.matmul %3, %31, %cst_41 {dimension_numbers = #tpu.dot_dimension_numbers<[1], [0], [0], [1], [0, 0, 1, 1], [], []>} : vector<8x32xf32>, vector<32x8xf32>, vector<8x8xf32> -> vector<8x8xf32>
    %c0_42 = arith.constant 0 : index
    %c1_43 = arith.constant 1 : index
    %c0_44 = arith.constant 0 : index
    %c0_45 = arith.constant 0 : index
    %33 = vector.load %arg9[%c0_42, %c1_43, %c0_44, %c0_45] : memref<1x4x8x8xf32, #tpu.memory_space<vmem>>, vector<1x1x8x8xf32>
    %34 = vector.shape_cast %33 : vector<1x1x8x8xf32> to vector<8x8xf32>
    %35 = vector.shape_cast %32 : vector<8x8xf32> to vector<1x1x8x8xf32>
    tpu.vector_store %arg9[%c0_42, %c1_43, %c0_44, %c0_45], %35 {strides = array<i32>} : memref<1x4x8x8xf32, #tpu.memory_space<vmem>>, vector<1x1x8x8xf32>,
    %c1_46 = arith.constant 1 : index
    %c0_47 = arith.constant 0 : index
    %c0_48 = arith.constant 0 : index
    %36 = vector.load %arg7[%c1_46, %c0_47, %c0_48] : memref<4x32x8xf32, #tpu.memory_space<vmem>>, vector<1x32x8xf32>
    %37 = vector.shape_cast %36 : vector<1x32x8xf32> to vector<32x8xf32>
    %cst_49 = arith.constant dense<0.000000e+00> : vector<8x8xf32>
    %38 = tpu.matmul %5, %37, %cst_49 {dimension_numbers = #tpu.dot_dimension_numbers<[1], [0], [0], [1], [0, 0, 1, 1], [], []>} : vector<8x32xf32>, vector<32x8xf32>, vector<8x8xf32> -> vector<8x8xf32>
    %c0_50 = arith.constant 0 : index
    %c1_51 = arith.constant 1 : index
    %c0_52 = arith.constant 0 : index
    %c0_53 = arith.constant 0 : index
    %39 = vector.load %arg10[%c0_50, %c1_51, %c0_52, %c0_53] : memref<1x4x8x8xf32, #tpu.memory_space<vmem>>, vector<1x1x8x8xf32>
    %40 = vector.shape_cast %39 : vector<1x1x8x8xf32> to vector<8x8xf32>
    %41 = vector.shape_cast %38 : vector<8x8xf32> to vector<1x1x8x8xf32>
    tpu.vector_store %arg10[%c0_50, %c1_51, %c0_52, %c0_53], %41 {strides = array<i32>} : memref<1x4x8x8xf32, #tpu.memory_space<vmem>>, vector<1x1x8x8xf32>,
    %c2 = arith.constant 2 : index
    %c0_54 = arith.constant 0 : index
    %c0_55 = arith.constant 0 : index
    %42 = vector.load %arg5[%c2, %c0_54, %c0_55] : memref<4x32x8xf32, #tpu.memory_space<vmem>>, vector<1x32x8xf32>
    %43 = vector.shape_cast %42 : vector<1x32x8xf32> to vector<32x8xf32>
    %cst_56 = arith.constant dense<0.000000e+00> : vector<8x8xf32>
    %44 = tpu.matmul %1, %43, %cst_56 {dimension_numbers = #tpu.dot_dimension_numbers<[1], [0], [0], [1], [0, 0, 1, 1], [], []>} : vector<8x32xf32>, vector<32x8xf32>, vector<8x8xf32> -> vector<8x8xf32>
    %c0_57 = arith.constant 0 : index
    %c2_58 = arith.constant 2 : index
    %c0_59 = arith.constant 0 : index
    %c0_60 = arith.constant 0 : index
    %45 = vector.load %arg8[%c0_57, %c2_58, %c0_59, %c0_60] : memref<1x4x8x8xf32, #tpu.memory_space<vmem>>, vector<1x1x8x8xf32>
    %46 = vector.shape_cast %45 : vector<1x1x8x8xf32> to vector<8x8xf32>
    %47 = vector.shape_cast %44 : vector<8x8xf32> to vector<1x1x8x8xf32>
    tpu.vector_store %arg8[%c0_57, %c2_58, %c0_59, %c0_60], %47 {strides = array<i32>} : memref<1x4x8x8xf32, #tpu.memory_space<vmem>>, vector<1x1x8x8xf32>,
    %c2_61 = arith.constant 2 : index
    %c0_62 = arith.constant 0 : index
    %c0_63 = arith.constant 0 : index
    %48 = vector.load %arg6[%c2_61, %c0_62, %c0_63] : memref<4x32x8xf32, #tpu.memory_space<vmem>>, vector<1x32x8xf32>
    %49 = vector.shape_cast %48 : vector<1x32x8xf32> to vector<32x8xf32>
    %cst_64 = arith.constant dense<0.000000e+00> : vector<8x8xf32>
    %50 = tpu.matmul %3, %49, %cst_64 {dimension_numbers = #tpu.dot_dimension_numbers<[1], [0], [0], [1], [0, 0, 1, 1], [], []>} : vector<8x32xf32>, vector<32x8xf32>, vector<8x8xf32> -> vector<8x8xf32>
    %c0_65 = arith.constant 0 : index
    %c2_66 = arith.constant 2 : index
    %c0_67 = arith.constant 0 : index
    %c0_68 = arith.constant 0 : index
    %51 = vector.load %arg9[%c0_65, %c2_66, %c0_67, %c0_68] : memref<1x4x8x8xf32, #tpu.memory_space<vmem>>, vector<1x1x8x8xf32>
    %52 = vector.shape_cast %51 : vector<1x1x8x8xf32> to vector<8x8xf32>
    %53 = vector.shape_cast %50 : vector<8x8xf32> to vector<1x1x8x8xf32>
    tpu.vector_store %arg9[%c0_65, %c2_66, %c0_67, %c0_68], %53 {strides = array<i32>} : memref<1x4x8x8xf32, #tpu.memory_space<vmem>>, vector<1x1x8x8xf32>,
    %c2_69 = arith.constant 2 : index
    %c0_70 = arith.constant 0 : index
    %c0_71 = arith.constant 0 : index
    %54 = vector.load %arg7[%c2_69, %c0_70, %c0_71] : memref<4x32x8xf32, #tpu.memory_space<vmem>>, vector<1x32x8xf32>
    %55 = vector.shape_cast %54 : vector<1x32x8xf32> to vector<32x8xf32>
    %cst_72 = arith.constant dense<0.000000e+00> : vector<8x8xf32>
    %56 = tpu.matmul %5, %55, %cst_72 {dimension_numbers = #tpu.dot_dimension_numbers<[1], [0], [0], [1], [0, 0, 1, 1], [], []>} : vector<8x32xf32>, vector<32x8xf32>, vector<8x8xf32> -> vector<8x8xf32>
    %c0_73 = arith.constant 0 : index
    %c2_74 = arith.constant 2 : index
    %c0_75 = arith.constant 0 : index
    %c0_76 = arith.constant 0 : index
    %57 = vector.load %arg10[%c0_73, %c2_74, %c0_75, %c0_76] : memref<1x4x8x8xf32, #tpu.memory_space<vmem>>, vector<1x1x8x8xf32>
    %58 = vector.shape_cast %57 : vector<1x1x8x8xf32> to vector<8x8xf32>
    %59 = vector.shape_cast %56 : vector<8x8xf32> to vector<1x1x8x8xf32>
    tpu.vector_store %arg10[%c0_73, %c2_74, %c0_75, %c0_76], %59 {strides = array<i32>} : memref<1x4x8x8xf32, #tpu.memory_space<vmem>>, vector<1x1x8x8xf32>,
    %c3 = arith.constant 3 : index
    %c0_77 = arith.constant 0 : index
    %c0_78 = arith.constant 0 : index
    %60 = vector.load %arg5[%c3, %c0_77, %c0_78] : memref<4x32x8xf32, #tpu.memory_space<vmem>>, vector<1x32x8xf32>
    %61 = vector.shape_cast %60 : vector<1x32x8xf32> to vector<32x8xf32>
    %cst_79 = arith.constant dense<0.000000e+00> : vector<8x8xf32>
    %62 = tpu.matmul %1, %61, %cst_79 {dimension_numbers = #tpu.dot_dimension_numbers<[1], [0], [0], [1], [0, 0, 1, 1], [], []>} : vector<8x32xf32>, vector<32x8xf32>, vector<8x8xf32> -> vector<8x8xf32>
    %c0_80 = arith.constant 0 : index
    %c3_81 = arith.constant 3 : index
    %c0_82 = arith.constant 0 : index
    %c0_83 = arith.constant 0 : index
    %63 = vector.load %arg8[%c0_80, %c3_81, %c0_82, %c0_83] : memref<1x4x8x8xf32, #tpu.memory_space<vmem>>, vector<1x1x8x8xf32>
    %64 = vector.shape_cast %63 : vector<1x1x8x8xf32> to vector<8x8xf32>
    %65 = vector.shape_cast %62 : vector<8x8xf32> to vector<1x1x8x8xf32>
    tpu.vector_store %arg8[%c0_80, %c3_81, %c0_82, %c0_83], %65 {strides = array<i32>} : memref<1x4x8x8xf32, #tpu.memory_space<vmem>>, vector<1x1x8x8xf32>,
    %c3_84 = arith.constant 3 : index
    %c0_85 = arith.constant 0 : index
    %c0_86 = arith.constant 0 : index
    %66 = vector.load %arg6[%c3_84, %c0_85, %c0_86] : memref<4x32x8xf32, #tpu.memory_space<vmem>>, vector<1x32x8xf32>
    %67 = vector.shape_cast %66 : vector<1x32x8xf32> to vector<32x8xf32>
    %cst_87 = arith.constant dense<0.000000e+00> : vector<8x8xf32>
    %68 = tpu.matmul %3, %67, %cst_87 {dimension_numbers = #tpu.dot_dimension_numbers<[1], [0], [0], [1], [0, 0, 1, 1], [], []>} : vector<8x32xf32>, vector<32x8xf32>, vector<8x8xf32> -> vector<8x8xf32>
    %c0_88 = arith.constant 0 : index
    %c3_89 = arith.constant 3 : index
    %c0_90 = arith.constant 0 : index
    %c0_91 = arith.constant 0 : index
    %69 = vector.load %arg9[%c0_88, %c3_89, %c0_90, %c0_91] : memref<1x4x8x8xf32, #tpu.memory_space<vmem>>, vector<1x1x8x8xf32>
    %70 = vector.shape_cast %69 : vector<1x1x8x8xf32> to vector<8x8xf32>
    %71 = vector.shape_cast %68 : vector<8x8xf32> to vector<1x1x8x8xf32>
    tpu.vector_store %arg9[%c0_88, %c3_89, %c0_90, %c0_91], %71 {strides = array<i32>} : memref<1x4x8x8xf32, #tpu.memory_space<vmem>>, vector<1x1x8x8xf32>,
    %c3_92 = arith.constant 3 : index
    %c0_93 = arith.constant 0 : index
    %c0_94 = arith.constant 0 : index
    %72 = vector.load %arg7[%c3_92, %c0_93, %c0_94] : memref<4x32x8xf32, #tpu.memory_space<vmem>>, vector<1x32x8xf32>
    %73 = vector.shape_cast %72 : vector<1x32x8xf32> to vector<32x8xf32>
    %cst_95 = arith.constant dense<0.000000e+00> : vector<8x8xf32>
    %74 = tpu.matmul %5, %73, %cst_95 {dimension_numbers = #tpu.dot_dimension_numbers<[1], [0], [0], [1], [0, 0, 1, 1], [], []>} : vector<8x32xf32>, vector<32x8xf32>, vector<8x8xf32> -> vector<8x8xf32>
    %c0_96 = arith.constant 0 : index
    %c3_97 = arith.constant 3 : index
    %c0_98 = arith.constant 0 : index
    %c0_99 = arith.constant 0 : index
    %75 = vector.load %arg10[%c0_96, %c3_97, %c0_98, %c0_99] : memref<1x4x8x8xf32, #tpu.memory_space<vmem>>, vector<1x1x8x8xf32>
    %76 = vector.shape_cast %75 : vector<1x1x8x8xf32> to vector<8x8xf32>
    %77 = vector.shape_cast %74 : vector<8x8xf32> to vector<1x1x8x8xf32>
    tpu.vector_store %arg10[%c0_96, %c3_97, %c0_98, %c0_99], %77 {strides = array<i32>} : memref<1x4x8x8xf32, #tpu.memory_space<vmem>>, vector<1x1x8x8xf32>,
    return
  }
  func.func @transform_0(%arg0: i32, %arg1: i32) -> (i32, i32, i32) {
    %c0_i32 = arith.constant 0 : i32
    %c0_i32_0 = arith.constant 0 : i32
    return %arg0, %arg1, %c0_i32 : i32, i32, i32
  }
  func.func @transform_1(%arg0: i32, %arg1: i32) -> (i32, i32, i32) {
    %c0_i32 = arith.constant 0 : i32
    %c0_i32_0 = arith.constant 0 : i32
    return %arg0, %arg1, %c0_i32 : i32, i32, i32
  }
  func.func @transform_2(%arg0: i32, %arg1: i32) -> (i32, i32, i32) {
    %c0_i32 = arith.constant 0 : i32
    %c0_i32_0 = arith.constant 0 : i32
    return %arg0, %arg1, %c0_i32 : i32, i32, i32
  }
  func.func @transform_3(%arg0: i32, %arg1: i32) -> (i32, i32, i32) {
    %c0_i32 = arith.constant 0 : i32
    %c0_i32_0 = arith.constant 0 : i32
    %c0_i32_1 = arith.constant 0 : i32
    %c0_i32_2 = arith.constant 0 : i32
    return %c0_i32, %c0_i32_0, %c0_i32_1 : i32, i32, i32
  }
  func.func @transform_4(%arg0: i32, %arg1: i32) -> (i32, i32, i32) {
    %c0_i32 = arith.constant 0 : i32
    %c0_i32_0 = arith.constant 0 : i32
    %c0_i32_1 = arith.constant 0 : i32
    %c0_i32_2 = arith.constant 0 : i32
    return %c0_i32, %c0_i32_0, %c0_i32_1 : i32, i32, i32
  }
  func.func @transform_5(%arg0: i32, %arg1: i32) -> (i32, i32, i32) {
    %c0_i32 = arith.constant 0 : i32
    %c0_i32_0 = arith.constant 0 : i32
    %c0_i32_1 = arith.constant 0 : i32
    %c0_i32_2 = arith.constant 0 : i32
    return %c0_i32, %c0_i32_0, %c0_i32_1 : i32, i32, i32
  }
  func.func @transform_6(%arg0: i32, %arg1: i32) -> (i32, i32, i32, i32) {
    %c0_i32 = arith.constant 0 : i32
    %c0_i32_0 = arith.constant 0 : i32
    %c0_i32_1 = arith.constant 0 : i32
    return %arg0, %c0_i32, %arg1, %c0_i32_0 : i32, i32, i32, i32
  }
  func.func @transform_7(%arg0: i32, %arg1: i32) -> (i32, i32, i32, i32) {
    %c0_i32 = arith.constant 0 : i32
    %c0_i32_0 = arith.constant 0 : i32
    %c0_i32_1 = arith.constant 0 : i32
    return %arg0, %c0_i32, %arg1, %c0_i32_0 : i32, i32, i32, i32
  }
  func.func @transform_8(%arg0: i32, %arg1: i32) -> (i32, i32, i32, i32) {
    %c0_i32 = arith.constant 0 : i32
    %c0_i32_0 = arith.constant 0 : i32
    %c0_i32_1 = arith.constant 0 : i32
    return %arg0, %c0_i32, %arg1, %c0_i32_0 : i32, i32, i32, i32
  }
}

</mosaic_0001>

<bundles_post_ra>
// kernel: tpu_custom_call.1
= control target key start
LH: loop header
LB: loop body
LE: loop exit
PB: predicated region body
PF: predicated region fallthrough
CT: control target
= control target key end

     0   :  { %s2585_s0 = inlined_call_operand.vmem [shape: f32[2,8,32], index: 0, kind: input, shape index: {}]   ;;  %s2586_s1 = inlined_call_operand.vmem [shape: f32[2,8,32], index: 1, kind: input, shape index: {}]   ;;  %s2587_s2 = inlined_call_operand.vmem [shape: f32[2,8,32], index: 2, kind: input, shape index: {}]   ;;  %s2588_s3 = inlined_call_operand.vmem [shape: f32[4,32,8], index: 3, kind: input, shape index: {}]   ;;  %s2589_s4 = inlined_call_operand.vmem [shape: f32[4,32,8], index: 4, kind: input, shape index: {}]   ;;  %s2590_s5 = inlined_call_operand.vmem [shape: f32[4,32,8], index: 5, kind: input, shape index: {}]   ;;  %s2591_s6 = inlined_call_operand.hbm [shape: f32[2,4,8,8], index: 6, kind: output, shape index: {0}]   ;;  %s2592_s7 = inlined_call_operand.hbm [shape: f32[2,4,8,8], index: 7, kind: output, shape index: {1}]   ;;  %s2593_s8 = inlined_call_operand.hbm [shape: f32[2,4,8,8], index: 8, kind: output, shape index: {2}]  }
   0x1   :  { %2600 = sst [smem:[#allocation9_spill]] %s2585_s0 }
   0x2   :  { %2601 = sst [smem:[#allocation10_spill]] %s2586_s1 }
   0x3   :  { %14 = vsyncpa [#allocation3], 0 }
   0x4   :  { %16 = vsyncpa [#allocation3 + $0x1], 0 }
   0x5   :  { %17 = vsyncpa [#allocation5], 0 }
   0x6   :  { %19 = vsyncpa [#allocation5 + $0x1], 0  ;;  %s2094_s27 = smov 0   ;;  %s2096_s28 = smov 0  }
   0x7   :  { %s2098_s29 = smov 0   ;;  %s2100_s30 = smov 0  }
   0x8   :  { %s2102_s9 = smov 0   ;;  %s2104_s10 = smov 0  }
   0x9 LB: > { %s2595_s11 = sadd.s32 4294967295, %s2040_s10   ;;  %s2594_s12 = sadd.s32 4294967294, %s2040_s10   ;;  %s2040_s10 = sphi %s2104_s10, %s25_s10   ;;  %s2036_s9 = sphi %s2102_s9, %s2614_s9   ;;  %s2032_s30 = sphi %s2100_s30, %s2613_s30   ;;  %s2028_s29 = sphi %s2098_s29, %s2612_s29   ;;  %s2024_s28 = sphi %s2096_s28, %s2611_s28   ;;  %s2020_s27 = sphi %s2094_s27, %s2610_s27  }
   0xa   : > { %s37_s13 = sadd.s32 1, %s2036_s9  ;;  %s193_s14 = sadd.s32 1, %s2028_s29 }
   0xb   : > { %p39_p0 = scmp.ge.s32.totalorder %s37_s13, 2  ;;  %p203_p1 = scmp.ne.s32.totalorder %s2028_s29, %s2024_s28 }
   0xc   : > { %p204_p2 = scmp.eq.s32.totalorder %s2595_s11, 1  ;;  %p209_p3 = scmp.ne.s32.totalorder %s2024_s28, %s2020_s27 }
   0xd   : > { %s2616_s13 = smov (%p39_p0, %s37_s13), 0  ;;  %p210_p5 = scmp.eq.s32.totalorder %s2594_s12, 1 }
   0xe   : > { %p2136_p4 = por %p204_p2, %p203_p1  ;;  %s188_s16 = ssub.s32 %s2036_s9, %s2616_s13 }
   0xf   : > { %p1569_p6 = scmp.ge.s32.totalorder %s2040_s10, 1  ;;  %p191_p7 = scmp.eq.s32.totalorder %s188_s16, 0 }
  0x10   : > { %p2145_p8 = por %p210_p5, %p209_p3  ;;  %p323_p9 = scmp.lt.s32.totalorder %s2040_s10, 3 }
  0x11   : > { %s2151_s18 = scalar_select %p191_p7, %s2028_s29, %s193_s14  }
  0x12   : > { %p324_p10 = pnand %p1569_p6, %p323_p9 }
  0x13   : > { %p383_p11 = scmp.lt.s32.totalorder (!%p324_p10), %s2032_s30, 1  ;;  %s2604_s0 = sld [smem:[#allocation9_spill]] (!%p324_p10) }
  0x14   : > { %327 = sbr.rel (%p324_p10) target bundleno = 330 (0x14a), region = 44  ;;  %s2605_s1 = sld [smem:[#allocation10_spill]] (!%p324_p10) }
  0x15   : > { %s366_s20 = sand.u32 (!%p324_p10), 1, %s2024_s28   ;;  %s2442_s24 = sshll.u32 (!%p324_p10), %s2032_s30, 9 }
  0x19   : > { %v410_v0 = vld [vmem:[%s2588_s3 + $0x18] sm:$0xff]  ;;  %v2042_v2 = vmov 0.0   ;;  %v409_v3 = vld [vmem:[%s2588_s3 + $0x10] sm:$0xff]  ;;  %s384_s14 = scalar_select %p383_p11, %s2032_s30, 1  ;;  %v408_v5 = vld [vmem:[%s2588_s3 + $0x8] sm:$0xff]  ;;  %vm411_vm0 = vcmask 261120  }
  0x1a   : > { %v490_v1 = vld [vmem:[%s2589_s4 + $0x18] sm:$0xff]  ;;  %1707 = vmatprep.subr.mxu0 %v2042_v2  ;;  %1718 = vmatprep.subr.mxu1 %v2042_v2  ;;  %v489_v4 = vld [vmem:[%s2589_s4 + $0x10] sm:$0xff]  ;;  %v488_v6 = vld [vmem:[%s2589_s4 + $0x8] sm:$0xff]  ;;  %vm2043_vm1 = vmmov 0   ;;  %vm485_vm2 = vcmask 64512   ;;  %s2458_s30 = scalar_lea.sflag [#allocation3], %s366_s20 }
  0x1b   : > { %1708 = vmatpush3.msra.mxu0 %v410_v0  ;;  %1719 = vmatpush3.msra.mxu1 %v490_v1  ;;  %s2177_s22 = sshll.u32 %s384_s14, 3  ;;  %v407_v7 = vld [vmem:[%s2588_s3] sm:$0xff]  ;;  %v568_v11 = vld [vmem:[%s2590_s5 + $0x18] sm:$0xff]  ;;  %v567_v13 = vld [vmem:[%s2590_s5 + $0x10] sm:$0xff] }
  0x1c   : > { %1709 = vmatprep.subr.mxu0 %v2042_v2  ;;  %1720 = vmatprep.subr.mxu1 %v2042_v2  ;;  %s389_s16 = scalar_lea.vmem %s2604_s0, %s2177_s22  ;;  %s396_s21 = scalar_lea.vmem %s2605_s1, %s2177_s22  ;;  %v487_v8 = vld [vmem:[%s2589_s4] sm:$0xff]  ;;  %v1582_v12 = vld [vmem:[%s2588_s3 + $0x38] sm:$0xff]  ;;  %v1581_v14 = vld [vmem:[%s2588_s3 + $0x30] sm:$0xff] }
  0x1d   : > { %1710 = vmatpush3.msra.mxu0 %v409_v3  ;;  %1721 = vmatpush3.msra.mxu1 %v489_v4  ;;  %v2197_v9 = vld [vmem:[%s389_s16] sm:$0xff]  ;;  %v566_v15 = vld [vmem:[%s2590_s5 + $0x8] sm:$0xff]  ;;  %s403_s26 = scalar_lea.vmem %s2587_s2, %s2177_s22  ;;  %v1588_v20 = vld [vmem:[%s2589_s4 + $0x38] sm:$0xff]  ;;  %s2450_s16 = scalar_lea.hbm %s2591_s6, %s2442_s24 }
  0x1e   : > { %1711 = vmatprep.subr.mxu0 %v2042_v2  ;;  %1722 = vmatprep.subr.mxu1 %v2042_v2  ;;  %v2199_v10 = vld [vmem:[%s396_s21] sm:$0xff]  ;;  %v1580_v16 = vld [vmem:[%s2588_s3 + $0x28] sm:$0xff]  ;;  %v1594_v21 = vld [vmem:[%s2590_s5 + $0x38] sm:$0xff]  ;;  %s1570_s21 = sshll.u32 %s366_s20, 5 }
  0x1f   : > { %1712 = vmatpush3.msra.mxu0 %v408_v5  ;;  %1723 = vmatpush3.msra.mxu1 %v488_v6  ;;  %v565_v17 = vld [vmem:[%s2590_s5] sm:$0xff]  ;;  %v1587_v22 = vld [vmem:[%s2589_s4 + $0x30] sm:$0xff]  ;;  %v1586_v24 = vld [vmem:[%s2589_s4 + $0x28] sm:$0xff]  ;;  %s2418_s22 = scalar_lea.vmem [#allocation2], %s1570_s21  ;;  %s2422_s14 = scalar_lea.vmem [#allocation4], %s1570_s21 }
  0x20   : > { %1713 = vmatprep.subr.mxu0 %v2042_v2  ;;  %1724 = vmatprep.subr.mxu1 %v2042_v2  ;;  %v1579_v18 = vld [vmem:[%s2588_s3 + $0x20] sm:$0xff]  ;;  %v1593_v23 = vld [vmem:[%s2590_s5 + $0x30] sm:$0xff]  ;;  %v1592_v25 = vld [vmem:[%s2590_s5 + $0x28] sm:$0xff]  ;;  %s2426_s12 = scalar_lea.vmem [#allocation6], %s1570_s21  ;;  %s1361_s23 = sshll.u32 %s2418_s22, 4  ;;  %s2444_s23 = int_to_ptr.vmem [resolvable:$true] %s1361_s23 }
  0x21   : > { %1714 = vmatpush3.msra.mxu0 %v407_v7  ;;  %1715 = vmatprep.mubr.msk.f32.mxu0 %vm2043_vm1, %v2042_v2  ;;  %v2245_v19 = vld [vmem:[%s403_s26] sm:$0xff]  ;;  %v1600_v28 = vld [vmem:[%s2588_s3 + $0x58] sm:$0xff]  ;;  %v1599_v30 = vld [vmem:[%s2588_s3 + $0x50] sm:$0xff]  ;;  %s1908_s19 = scalar_lea.vmem %s2444_s23, 512  ;;  %s2044_s21 = smov [#allocation2]  }
  0x22   : > { %1725 = vmatpush3.msra.mxu1 %v487_v8  ;;  %1726 = vmatprep.mubr.msk.f32.mxu1 %vm2043_vm1, %v2042_v2  ;;  %v1585_v26 = vld [vmem:[%s2589_s4 + $0x20] sm:$0xff]  ;;  %v1606_v29 = vld [vmem:[%s2589_s4 + $0x58] sm:$0xff]  ;;  %v1605_v31 = vld [vmem:[%s2589_s4 + $0x50] sm:$0xff]  ;;  %p1909_p12 = scmp.ne.s32.totalorder %s2444_s23, %s1908_s19  ;;  %s1912_s25 = sshll.u32 %s2044_s21, 4  ;;  %s1913_s25 = int_to_ptr.vmem [resolvable:$false] %s1912_s25 }
  0x23   : > { %1716 = vmatmul.mubr.msk.f32.vlgmr.msra.gmra.mxu0 %vm411_vm0, %v2197_v9  ;;  %1727 = vmatmul.mubr.msk.f32.vlgmr.msra.gmra.mxu1 %vm411_vm0, %v2199_v10  ;;  %v1591_v27 = vld [vmem:[%s2590_s5 + $0x20] sm:$0xff]  ;;  %v1598_v32 = vld [vmem:[%s2588_s3 + $0x48] sm:$0xff]  ;;  %v1612_v36 = vld [vmem:[%s2590_s5 + $0x58] sm:$0xff]  ;;  %s1914_s26 = scalar_lea.vmem %s1913_s25, 1024  ;;  %p1915_p1 = scmp.lt.s32.totalorder %s2444_s23, %s1913_s25 }
  0x24   : > { %1729 = vmatprep.subr.mxu0 %v2042_v2  ;;  %1740 = vmatprep.subr.mxu1 %v2042_v2  ;;  %v1604_v33 = vld [vmem:[%s2589_s4 + $0x48] sm:$0xff]  ;;  %v1597_v34 = vld [vmem:[%s2588_s3 + $0x40] sm:$0xff]  ;;  %v1618_v37 = vld [vmem:[%s2588_s3 + $0x78] sm:$0xff]  ;;  %p1910_p13 = pnand %p1909_p12, %p2136_p4  ;;  %p1916_p2 = scmp.lt.s32.totalorder %s1914_s26, %s1908_s19 }
  0x25   : > { %1730 = vmatpush3.msra.mxu0 %v568_v11  ;;  %1741 = vmatpush3.msra.mxu1 %v1582_v12  ;;  %v1603_v35 = vld [vmem:[%s2589_s4 + $0x40] sm:$0xff]  ;;  %v1611_v38 = vld [vmem:[%s2590_s5 + $0x50] sm:$0xff]  ;;  %v1610_v40 = vld [vmem:[%s2590_s5 + $0x48] sm:$0xff] }
  0x26   : > { %1731 = vmatprep.subr.mxu0 %v2042_v2  ;;  %1742 = vmatprep.subr.mxu1 %v2042_v2  ;;  %v1617_v39 = vld [vmem:[%s2588_s3 + $0x70] sm:$0xff]  ;;  %v1616_v41 = vld [vmem:[%s2588_s3 + $0x68] sm:$0xff]  ;;  %v1609_v42 = vld [vmem:[%s2590_s5 + $0x40] sm:$0xff]  ;;  %p1911_p0 = pneg %p1910_p13  ;;  %p1917_p3 = por %p1916_p2, %p1915_p1 }
  0x27   : > { %1732 = vmatpush3.msra.mxu0 %v567_v13  ;;  %1743 = vmatpush3.msra.mxu1 %v1581_v14  ;;  %v1615_v43 = vld [vmem:[%s2588_s3 + $0x60] sm:$0xff]  ;;  %v1624_v44 = vld [vmem:[%s2589_s4 + $0x78] sm:$0xff]  ;;  %v1623_v46 = vld [vmem:[%s2589_s4 + $0x70] sm:$0xff] }
  0x28   : > { %1733 = vmatprep.subr.mxu0 %v2042_v2  ;;  %1744 = vmatprep.subr.mxu1 %v2042_v2  ;;  %v1630_v45 = vld [vmem:[%s2590_s5 + $0x78] sm:$0xff]  ;;  %v1629_v47 = vld [vmem:[%s2590_s5 + $0x70] sm:$0xff]  ;;  %v1622_v48 = vld [vmem:[%s2589_s4 + $0x68] sm:$0xff]  ;;  %p1918_p5 = pnand %p1917_p3, %p1911_p0 }
  0x29   : > { %1734 = vmatpush3.msra.mxu0 %v566_v15  ;;  %1745 = vmatpush3.msra.mxu1 %v1580_v16  ;;  %v1628_v49 = vld [vmem:[%s2590_s5 + $0x68] sm:$0xff]  ;;  %v1621_v50 = vld [vmem:[%s2589_s4 + $0x60] sm:$0xff] }
  0x2a   : > { %1735 = vmatprep.subr.mxu0 %v2042_v2  ;;  %1746 = vmatprep.subr.mxu1 %v2042_v2  ;;  %v1627_v51 = vld [vmem:[%s2590_s5 + $0x60] sm:$0xff] }
  0x2b   : > { %1736 = vmatpush3.msra.mxu0 %v565_v17  ;;  %1737 = vmatprep.mubr.msk.f32.mxu0 %vm2043_vm1, %v2042_v2 }
  0x2c   : > { %1747 = vmatpush3.msra.mxu1 %v1579_v18  ;;  %1748 = vmatprep.mubr.msk.f32.mxu1 %vm2043_vm1, %v2042_v2 }
  0x2d   : > { %1738 = vmatmul.mubr.msk.f32.vlgmr.msra.gmra.mxu0 %vm411_vm0, %v2245_v19  ;;  %1749 = vmatmul.mubr.msk.f32.vlgmr.msra.gmra.mxu1 %vm411_vm0, %v2197_v9 }
  0x2e   : > { %1751 = vmatprep.subr.mxu0 %v2042_v2  ;;  %1762 = vmatprep.subr.mxu1 %v2042_v2 }
  0x2f   : > { %1752 = vmatpush3.msra.mxu0 %v1588_v20  ;;  %1763 = vmatpush3.msra.mxu1 %v1594_v21 }
  0x30   : > { %1753 = vmatprep.subr.mxu0 %v2042_v2  ;;  %1764 = vmatprep.subr.mxu1 %v2042_v2 }
  0x31   : > { %1754 = vmatpush3.msra.mxu0 %v1587_v22  ;;  %1765 = vmatpush3.msra.mxu1 %v1593_v23 }
  0x32   : > { %1755 = vmatprep.subr.mxu0 %v2042_v2  ;;  %1766 = vmatprep.subr.mxu1 %v2042_v2 }
  0x33   : > { %1756 = vmatpush3.msra.mxu0 %v1586_v24  ;;  %1767 = vmatpush3.msra.mxu1 %v1592_v25 }
  0x34   : > { %1757 = vmatprep.subr.mxu0 %v2042_v2  ;;  %1768 = vmatprep.subr.mxu1 %v2042_v2 }
  0x35   : > { %1758 = vmatpush3.msra.mxu0 %v1585_v26  ;;  %1759 = vmatprep.mubr.msk.f32.mxu0 %vm2043_vm1, %v2042_v2 }
  0x36   : > { %1769 = vmatpush3.msra.mxu1 %v1591_v27  ;;  %1770 = vmatprep.mubr.msk.f32.mxu1 %vm2043_vm1, %v2042_v2 }
  0x37   : > { %1760 = vmatmul.mubr.msk.f32.vlgmr.msra.gmra.mxu0 %vm411_vm0, %v2199_v10  ;;  %1771 = vmatmul.mubr.msk.f32.vlgmr.msra.gmra.mxu1 %vm411_vm0, %v2245_v19 }
  0x38   : > { %1773 = vmatprep.subr.mxu0 %v2042_v2  ;;  %1784 = vmatprep.subr.mxu1 %v2042_v2 }
  0x39   : > { %1774 = vmatpush3.msra.mxu0 %v1600_v28  ;;  %1785 = vmatpush3.msra.mxu1 %v1606_v29 }
  0x3a   : > { %1775 = vmatprep.subr.mxu0 %v2042_v2  ;;  %1786 = vmatprep.subr.mxu1 %v2042_v2 }
  0x3b   : > { %1776 = vmatpush3.msra.mxu0 %v1599_v30  ;;  %1787 = vmatpush3.msra.mxu1 %v1605_v31 }
  0x3c   : > { %1777 = vmatprep.subr.mxu0 %v2042_v2  ;;  %1788 = vmatprep.subr.mxu1 %v2042_v2 }
  0x3d   : > { %1778 = vmatpush3.msra.mxu0 %v1598_v32  ;;  %1789 = vmatpush3.msra.mxu1 %v1604_v33 }
  0x3e   : > { %1779 = vmatprep.subr.mxu0 %v2042_v2  ;;  %1790 = vmatprep.subr.mxu1 %v2042_v2 }
  0x3f   : > { %1780 = vmatpush3.msra.mxu0 %v1597_v34  ;;  %1781 = vmatprep.mubr.msk.f32.mxu0 %vm2043_vm1, %v2042_v2 }
  0x40   : > { %1791 = vmatpush3.msra.mxu1 %v1603_v35  ;;  %1792 = vmatprep.mubr.msk.f32.mxu1 %vm2043_vm1, %v2042_v2 }
  0x41   : > { %1782 = vmatmul.mubr.msk.f32.vlgmr.msra.gmra.mxu0 %vm411_vm0, %v2197_v9  ;;  %1793 = vmatmul.mubr.msk.f32.vlgmr.msra.gmra.mxu1 %vm411_vm0, %v2199_v10 }
  0x42   : > { %1795 = vmatprep.subr.mxu0 %v2042_v2  ;;  %1806 = vmatprep.subr.mxu1 %v2042_v2 }
  0x43   : > { %1796 = vmatpush3.msra.mxu0 %v1612_v36  ;;  %1807 = vmatpush3.msra.mxu1 %v1618_v37 }
  0x44   : > { %1797 = vmatprep.subr.mxu0 %v2042_v2  ;;  %1808 = vmatprep.subr.mxu1 %v2042_v2 }
  0x45   : > { %1798 = vmatpush3.msra.mxu0 %v1611_v38  ;;  %1809 = vmatpush3.msra.mxu1 %v1617_v39 }
  0x46   : > { %1799 = vmatprep.subr.mxu0 %v2042_v2  ;;  %1810 = vmatprep.subr.mxu1 %v2042_v2 }
  0x47   : > { %1800 = vmatpush3.msra.mxu0 %v1610_v40  ;;  %1811 = vmatpush3.msra.mxu1 %v1616_v41 }
  0x48   : > { %1801 = vmatprep.subr.mxu0 %v2042_v2  ;;  %1812 = vmatprep.subr.mxu1 %v2042_v2 }
  0x49   : > { %1802 = vmatpush3.msra.mxu0 %v1609_v42  ;;  %1803 = vmatprep.mubr.msk.f32.mxu0 %vm2043_vm1, %v2042_v2 }
  0x4a   : > { %1813 = vmatpush3.msra.mxu1 %v1615_v43  ;;  %1814 = vmatprep.mubr.msk.f32.mxu1 %vm2043_vm1, %v2042_v2 }
  0x4b   : > { %1804 = vmatmul.mubr.msk.f32.vlgmr.msra.gmra.mxu0 %vm411_vm0, %v2245_v19  ;;  %1815 = vmatmul.mubr.msk.f32.vlgmr.msra.gmra.mxu1 %vm411_vm0, %v2197_v9 }
  0x4c   : > { %1817 = vmatprep.subr.mxu0 %v2042_v2  ;;  %1828 = vmatprep.subr.mxu1 %v2042_v2 }
  0x4d   : > { %1818 = vmatpush3.msra.mxu0 %v1624_v44  ;;  %1829 = vmatpush3.msra.mxu1 %v1630_v45 }
  0x4e   : > { %1819 = vmatprep.subr.mxu0 %v2042_v2  ;;  %1830 = vmatprep.subr.mxu1 %v2042_v2 }
  0x4f   : > { %1820 = vmatpush3.msra.mxu0 %v1623_v46  ;;  %1831 = vmatpush3.msra.mxu1 %v1629_v47 }
  0x50   : > { %1821 = vmatprep.subr.mxu0 %v2042_v2  ;;  %1832 = vmatprep.subr.mxu1 %v2042_v2 }
  0x51   : > { %1822 = vmatpush3.msra.mxu0 %v1622_v48  ;;  %1833 = vmatpush3.msra.mxu1 %v1628_v49 }
  0x52   : > { %1823 = vmatprep.subr.mxu0 %v2042_v2  ;;  %1834 = vmatprep.subr.mxu1 %v2042_v2 }
  0x53   : > { %1824 = vmatpush3.msra.mxu0 %v1621_v50  ;;  %1825 = vmatprep.mubr.msk.f32.mxu0 %vm2043_vm1, %v2042_v2 }
  0x54   : > { %1835 = vmatpush3.msra.mxu1 %v1627_v51  ;;  %1836 = vmatprep.mubr.msk.f32.mxu1 %vm2043_vm1, %v2042_v2 }
  0x55   : > { %1826 = vmatmul.mubr.msk.f32.vlgmr.msra.gmra.mxu0 %vm411_vm0, %v2199_v10  ;;  %1837 = vmatmul.mubr.msk.f32.vlgmr.msra.gmra.mxu1 %vm411_vm0, %v2245_v19 }
  0xe3   : > { %v481_v52 = vpop.f32.mrf.mxu0  ;;  %v560_v53 = vpop.f32.mrf.mxu1 }
  0xe4   : > { %486 = vst.msk [vmem:[%s2418_s22] sm:$0xff] %vm485_vm2, %v481_v52  ;;  %564 = vst.msk [vmem:[%s2422_s14] sm:$0xff] %vm485_vm2, %v560_v53 }
  0xe5   : > { %v1717_v54 = vpop.f32.mrf.mxu0  ;;  %v1728_v55 = vpop.f32.mrf.mxu1 }
  0xed   : > { %v638_v56 = vpop.f32.mrf.mxu0  ;;  %v714_v57 = vpop.f32.mrf.mxu1 }
  0xee   : > { %642 = vst.msk [vmem:[%s2426_s12] sm:$0xff] %vm485_vm2, %v638_v56  ;;  %1584 = vst.msk [vmem:[%s2418_s22 + $0x8] sm:$0xff] %vm485_vm2, %v714_v57 }
  0xef   : > { %v1739_v58 = vpop.f32.mrf.mxu0  ;;  %v1750_v59 = vpop.f32.mrf.mxu1 }
  0xf7   : > { %v791_v60 = vpop.f32.mrf.mxu0  ;;  %v868_v61 = vpop.f32.mrf.mxu1 }
  0xf8   : > { %1590 = vst.msk [vmem:[%s2422_s14 + $0x8] sm:$0xff] %vm485_vm2, %v791_v60  ;;  %1596 = vst.msk [vmem:[%s2426_s12 + $0x8] sm:$0xff] %vm485_vm2, %v868_v61 }
  0xf9   : > { %v1761_v62 = vpop.f32.mrf.mxu0  ;;  %v1772_v63 = vpop.f32.mrf.mxu1 }
 0x101   : > { %v945_v0 = vpop.f32.mrf.mxu0  ;;  %v1022_v1 = vpop.f32.mrf.mxu1 }
 0x102   : > { %1602 = vst.msk [vmem:[%s2418_s22 + $0x10] sm:$0xff] %vm485_vm2, %v945_v0  ;;  %1608 = vst.msk [vmem:[%s2422_s14 + $0x10] sm:$0xff] %vm485_vm2, %v1022_v1 }
 0x103   : > { %v1783_v2 = vpop.f32.mrf.mxu0  ;;  %v1794_v3 = vpop.f32.mrf.mxu1 }
 0x10b   : > { %v1099_v4 = vpop.f32.mrf.mxu0  ;;  %v1176_v5 = vpop.f32.mrf.mxu1 }
 0x10c   : > { %1614 = vst.msk [vmem:[%s2426_s12 + $0x10] sm:$0xff] %vm485_vm2, %v1099_v4  ;;  %1620 = vst.msk [vmem:[%s2418_s22 + $0x18] sm:$0xff] %vm485_vm2, %v1176_v5 }
 0x10d   : > { %v1805_v6 = vpop.f32.mrf.mxu0  ;;  %v1816_v7 = vpop.f32.mrf.mxu1 }
 0x10e   : > { %1921 = shalt.err (!%p1918_p5)
}
 0x10f   : > { %s1922_s20 = scalar_lea.hbm %s2450_s16, 512  ;;  %s1926_s21 = scalar_lea.hbm %s2591_s6, 1024 }
 0x110   : > { %p1923_p6 = scmp.ne.s32.totalorder %s2450_s16, %s1922_s20  ;;  %p1927_p10 = scmp.lt.s32.totalorder %s2450_s16, %s2591_s6 }
 0x111   : > { %p1928_p11 = scmp.lt.s32.totalorder %s1926_s21, %s1922_s20 }
 0x112   : > { %p1924_p7 = pnand %p1923_p6, %p2136_p4 }
 0x113   : > { %p1929_p12 = por %p1928_p11, %p1927_p10 }
 0x114   : > { %p1925_p9 = pneg %p1924_p7 }
 0x116   : > { %p1930_p13 = pnand %p1929_p12, %p1925_p9 }
 0x118   : > { %1933 = shalt.err (!%p1930_p13)
}
 0x119   : > { %s2596_s19 = smov 128   ;;  %s2598_s11 = smov 8   ;;  %v1253_v8 = vpop.f32.mrf.mxu0  ;;  %v1330_v9 = vpop.f32.mrf.mxu1 }
 0x11a   : > { %1839 = dma.vmem_to_hbm [thread:$0]  (%p2136_p4), %s2444_s23, 512, %s2450_s16, %s2458_s30, %s2596_s19, %s2596_s19, %s2598_s11  }
 0x11b   : > { %s1378_s0 = sshll.u32 %s2422_s14, 4  ;;  %s2606_s1 = sadd.s32 4294967295, %s2040_s10   ;;  %1626 = vst.msk [vmem:[%s2422_s14 + $0x18] sm:$0xff] %vm485_vm2, %v1253_v8  ;;  %1632 = vst.msk [vmem:[%s2426_s12 + $0x18] sm:$0xff] %vm485_vm2, %v1330_v9  ;;  %v1827_v10 = vpop.f32.mrf.mxu0  ;;  %v1838_v11 = vpop.f32.mrf.mxu1  ;;  %s2490_s0 = int_to_ptr.vmem [resolvable:$true] %s1378_s0 }
 0x11c   : > { %s2487_s25 = sand.u32 1, %s2606_s1   ;;  %s1395_s26 = sshll.u32 %s2426_s12, 4  ;;  %s2498_s26 = int_to_ptr.vmem [resolvable:$true] %s1395_s26 }
 0x11d   : > { %s2496_s21 = scalar_lea.hbm %s2592_s7, %s2442_s24  ;;  %s2504_s30 = scalar_lea.hbm %s2593_s8, %s2442_s24 }
 0x11e   : > { %s1342_s1 = scalar_lea.sflag [#allocation5], %s2487_s25  ;;  %s1934_s20 = scalar_lea.vmem %s2490_s0, 512 }
 0x11f   : > { %p1935_p0 = scmp.ne.s32.totalorder %s2490_s0, %s1934_s20  ;;  %s2047_s22 = smov [#allocation4]  }
 0x120   : > { %s1938_s19 = sshll.u32 %s2047_s22, 4  ;;  %s1939_s19 = int_to_ptr.vmem [resolvable:$false] %s1938_s19 }
 0x121   : > { %p1936_p1 = pnand %p1935_p0, %p2136_p4  ;;  %s1940_s11 = scalar_lea.vmem %s1939_s19, 1024 }
 0x122   : > { %p1941_p3 = scmp.lt.s32.totalorder %s2490_s0, %s1939_s19  ;;  %p1942_p5 = scmp.lt.s32.totalorder %s1940_s11, %s1934_s20 }
 0x123   : > { %p1937_p2 = pneg %p1936_p1 }
 0x124   : > { %p1943_p6 = por %p1942_p5, %p1941_p3 }
 0x126   : > { %p1944_p7 = pnand %p1943_p6, %p1937_p2 }
 0x128   : > { %1947 = shalt.err (!%p1944_p7)
}
 0x129   : > { %s1948_s14 = scalar_lea.hbm %s2496_s21, 512  ;;  %s1952_s23 = scalar_lea.hbm %s2592_s7, 1024 }
 0x12a   : > { %p1949_p9 = scmp.ne.s32.totalorder %s2496_s21, %s1948_s14  ;;  %p1953_p12 = scmp.lt.s32.totalorder %s2496_s21, %s2592_s7 }
 0x12b   : > { %p1954_p13 = scmp.lt.s32.totalorder %s1952_s23, %s1948_s14 }
 0x12c   : > { %p1950_p10 = pnand %p1949_p9, %p2136_p4 }
 0x12d   : > { %p1955_p0 = por %p1954_p13, %p1953_p12 }
 0x12e   : > { %p1951_p11 = pneg %p1950_p10 }
 0x130   : > { %p1956_p1 = pnand %p1955_p0, %p1951_p11 }
 0x132   : > { %1959 = shalt.err (!%p1956_p1)
}
 0x133   : > { %s2607_s19 = smov 8   ;;  %s2608_s11 = smov 128  }
 0x134   : > { %1840 = dma.vmem_to_hbm [thread:$0]  (%p2136_p4), %s2490_s0, 512, %s2496_s21, %s1342_s1, %s2608_s11, %s2608_s11, %s2607_s19  }
 0x135   : > { %s1960_s20 = scalar_lea.vmem %s2498_s26, 512  ;;  %s2048_s14 = smov [#allocation6]  }
 0x136   : > { %p1961_p2 = scmp.ne.s32.totalorder %s2498_s26, %s1960_s20  ;;  %s1964_s12 = sshll.u32 %s2048_s14, 4  ;;  %s1965_s12 = int_to_ptr.vmem [resolvable:$false] %s1964_s12 }
 0x137   : > { %s1966_s24 = scalar_lea.vmem %s1965_s12, 1024  ;;  %p1967_p6 = scmp.lt.s32.totalorder %s2498_s26, %s1965_s12 }
 0x138   : > { %p1962_p3 = pnand %p1961_p2, %p2136_p4  ;;  %p1968_p7 = scmp.lt.s32.totalorder %s1966_s24, %s1960_s20 }
 0x13a   : > { %p1963_p5 = pneg %p1962_p3  ;;  %p1969_p9 = por %p1968_p7, %p1967_p6 }
 0x13c   : > { %p1970_p10 = pnand %p1969_p9, %p1963_p5 }
 0x13e   : > { %1973 = shalt.err (!%p1970_p10)
}
 0x13f   : > { %s1974_s23 = scalar_lea.hbm %s2504_s30, 512  ;;  %s1978_s16 = scalar_lea.hbm %s2593_s8, 1024 }
 0x140   : > { %p1975_p11 = scmp.ne.s32.totalorder %s2504_s30, %s1974_s23  ;;  %p1979_p0 = scmp.lt.s32.totalorder %s2504_s30, %s2593_s8 }
 0x141   : > { %p1980_p1 = scmp.lt.s32.totalorder %s1978_s16, %s1974_s23 }
 0x142   : > { %p1976_p12 = pnand %p1975_p11, %p2136_p4 }
 0x143   : > { %p1981_p2 = por %p1980_p1, %p1979_p0 }
 0x144   : > { %p1977_p13 = pneg %p1976_p12 }
 0x146   : > { %p1982_p3 = pnand %p1981_p2, %p1977_p13 }
 0x148   : > { %1985 = shalt.err (!%p1982_p3)
}
 0x149   : > { %1841 = dma.vmem_to_hbm [thread:$0]  (%p2136_p4), %s2498_s26, 512, %s2504_s30, %s1342_s1, %s2608_s11, %s2608_s11, %s2607_s19  }
 0x14a PF: > { %p1855_p5 = scmp.ge.s32.totalorder %s2040_s10, 2  ;;  %s1410_s20 = sand.u32 1, %s2020_s27  }
 0x14b   : > { %s1411_s12 = scalar_lea.sflag [#allocation3], %s1410_s20 }
 0x14c   : > { %p1846_p6 = pnand %p1855_p5, %p2145_p8 }
 0x14e   : > { %p1847_p7 = pneg %p1846_p6 }
 0x150   : > { %2011 = dma.done.wait (%p1847_p7), %s1411_s12, 512  }
 0x151   : > { %2013 = vsyncadd (%p1847_p7), %s1411_s12, 4294966784  ;;  %s2609_s15 = sadd.s32 4294967294, %s2040_s10  }
 0x152   : > { %s1419_s24 = sand.u32 1, %s2609_s15  }
 0x153   : > { %s1420_s23 = scalar_lea.sflag [#allocation5], %s1419_s24 }
 0x154   : > { %2015 = dma.done.wait (%p1847_p7), %s1420_s23, 1024  }
 0x155   : > { %2017 = vsyncadd (%p1847_p7), %s1420_s23, 4294966272  ;;  %s25_s10 = sadd.s32 1, %s2040_s10   ;;  %s2610_s27 = smov %s2024_s28 }
 0x156   : > { %p22_p4 = scmp.ge.s32.totalorder %s25_s10, 4   ;;  %s2611_s28 = smov %s2028_s29 }
 0x157   : > { %s2612_s29 = smov %s2151_s18  ;;  %s2613_s30 = smov %s2036_s9 }
 0x158   : > { %s2614_s9 = smov %s2616_s13  ;;  %24 = sbr.rel (!%p22_p4) target bundleno = 9 (0x9), region = 135 }
 0x15d   :  { %1434 = vsyncpa [#allocation3], 1 }
 0x15e   :  { %1436 = vsyncpa [#allocation3 + $0x1], 1 }
 0x15f   :  { %1437 = vsyncpa [#allocation5], 1 }
 0x160   :  { %1439 = vsyncpa [#allocation5 + $0x1], 1 }

</bundles_post_ra>
